<compile_context>
chip_gen: v6e
topology: v6e:2x2x1
jax: 0.10.0
libtpu: 0.0.40
codegen_flags: <defaults>
</compile_context>

<pallas_src>
from typing import NamedTuple

import jax
import jax.numpy as jnp
from jax.experimental import pallas as pl
from jax.experimental.pallas import tpu as pltpu


def _round_up(a: int, m: int) -> int:
    return ((a + m - 1) // m) * m


def _cdiv(a: int, b: int) -> int:
    return (a + b - 1) // b


def _pick_divisor_tile(dim: int, target: int, granule: int = 128) -> int:
    """Largest multiple of `granule` that divides `dim` and is <= target (dim is
    already a multiple of `granule`, so this always terminates at >= granule)."""
    t = min(dim, max(granule, (target // granule) * granule))
    while dim % t != 0:
        t -= granule
    return t


# ----------------------------------------------------------------------------
# Kernels.
# ----------------------------------------------------------------------------
def _sq_linear_kernel_acc(x_ref, w_ref, b_ref, o_ref, acc_ref):
    """Tiled matmul with an f32 VMEM accumulator (used when out dtype != f32)."""
    k = pl.program_id(2)

    @pl.when(k == 0)
    def _init():
        acc_ref[...] = jnp.zeros_like(acc_ref)

    acc_ref[...] += jnp.dot(
        x_ref[...], w_ref[...], preferred_element_type=jnp.float32
    )

    @pl.when(k == pl.num_programs(2) - 1)
    def _finalize():
        o_ref[...] = (acc_ref[...] + b_ref[...]).astype(o_ref.dtype)


def _sq_linear_kernel_f32out(x_ref, w_ref, b_ref, o_ref):
    """f32-output variant: accumulate directly into the resident output block
    (no scratch); bias is loaded into the accumulator at k == 0."""
    k = pl.program_id(2)

    @pl.when(k == 0)
    def _init():
        o_ref[...] = jnp.zeros(o_ref.shape, o_ref.dtype) + b_ref[...]

    o_ref[...] += jnp.dot(
        x_ref[...], w_ref[...], preferred_element_type=jnp.float32
    )


# ----------------------------------------------------------------------------
# One-time (init) parameter prep — mirrors registering buffers in the module.
# ----------------------------------------------------------------------------
class SQLinearParams(NamedTuple):
    w_kn: jax.Array      # (Kp, Np) scale-folded, transposed, padded, compute dtype
    bias: jax.Array      # (1, Np) float32, padded
    in_features: int     # K (unpadded)
    out_features: int    # N (unpadded)


def prepare_sq_linear_params(
    weight, input_scale, bias=None, compute_dtype=jnp.bfloat16
) -> SQLinearParams:
    """Fold the SmoothQuant input_scale into the weight, transpose, pad, cast.

    weight: (N, K) nn.Linear layout; input_scale: (K,); bias: (N,) or None.
    The scale fold is done in f32 before the (single) cast to compute_dtype so
    bf16 rounding is not compounded with the scale multiply.
    """
    N, K = weight.shape
    w_kn = (
        weight.astype(jnp.float32) * input_scale[None, :].astype(jnp.float32)
    ).T  # (K, N)

    Kp, Np = _round_up(K, 128), _round_up(N, 128)
    if (Kp, Np) != (K, N):
        w_kn = jnp.pad(w_kn, ((0, Kp - K), (0, Np - N)))
    w_kn = w_kn.astype(compute_dtype)

    if bias is None:
        b2d = jnp.zeros((1, Np), jnp.float32)
    else:
        b2d = bias.astype(jnp.float32).reshape(1, N)
        if Np != N:
            b2d = jnp.pad(b2d, ((0, 0), (0, Np - N)))

    return SQLinearParams(w_kn, b2d, K, N)


# ----------------------------------------------------------------------------
# Forward wrapper.
# ----------------------------------------------------------------------------
def sq_linear_forward(x, params: SQLinearParams, *, tm_max=512,
                      tn_target=512, tk_target=None):
    """x: [..., K]; params from prepare_sq_linear_params. Output dtype == x.dtype."""
    *lead, K = x.shape
    assert K == params.in_features, (
        f"activation K={K} does not match layer K={params.in_features}"
    )
    Kp, Np = params.w_kn.shape
    N = params.out_features
    out_dtype = x.dtype

    M = 1
    for d in lead:
        M *= d
    M = max(M, 1)

    # --- M tiling: pad only to 16 rows, balance tiles, minimize #M-tiles. ---
    MIN_TILE_M = 16  # satisfies (8,128) f32 and (16,128) bf16 sublane tiling
    Mp0 = _round_up(M, MIN_TILE_M)
    n_m = _cdiv(Mp0, tm_max)
    tm = _round_up(_cdiv(Mp0, n_m), MIN_TILE_M)
    Mp = tm * n_m

    # --- N/K tiling: divisors of the init-time padded dims. Small-M (decode)
    #     calls get large K tiles so weight DMAs stay long. ---
    small_m = Mp0 <= 256
    if tk_target is None:
        tk_target = 2048 if small_m else 512
    tn = _pick_divisor_tile(Np, tn_target)
    tk = _pick_divisor_tile(Kp, tk_target)

    # --- per-call activation prep (cast to compute dtype, pad M/K). ---
    x2d = x.reshape(M, K)
    if x2d.dtype != params.w_kn.dtype:
        x2d = x2d.astype(params.w_kn.dtype)
    if (Mp, Kp) != (M, K):
        x2d = jnp.pad(x2d, ((0, Mp - M), (0, Kp - K)))

    grid = (Mp // tm, Np // tn, Kp // tk)

    accumulate_in_out = jnp.dtype(out_dtype) == jnp.dtype(jnp.float32)
    in_itemsize = jnp.dtype(params.w_kn.dtype).itemsize
    out_itemsize = jnp.dtype(out_dtype).itemsize

    # Double-buffered tile footprint -> VMEM limit (cap 48 MiB for v7x 64 MiB/TC).
    vmem_bytes = (
        2 * (tm * tk + tk * tn) * in_itemsize   # x + w input buffers
        + 2 * tn * 4                            # bias buffers
        + 2 * tm * tn * out_itemsize            # output buffers
    )
    if accumulate_in_out:
        kernel = _sq_linear_kernel_f32out
        scratch_shapes = []
    else:
        kernel = _sq_linear_kernel_acc
        scratch_shapes = [pltpu.VMEM((tm, tn), jnp.float32)]
        vmem_bytes += tm * tn * 4
    vmem_limit = int(min(48 * 1024 * 1024, max(32 * 1024 * 1024, 2 * vmem_bytes)))

    bytes_accessed = (
        x2d.size * x2d.dtype.itemsize
        + params.w_kn.size * in_itemsize
        + params.bias.size * 4
        + Mp * Np * out_itemsize
    )

    out2d = pl.pallas_call(
        kernel,
        out_shape=jax.ShapeDtypeStruct((Mp, Np), out_dtype),
        grid_spec=pltpu.PrefetchScalarGridSpec(
            num_scalar_prefetch=0,
            grid=grid,
            in_specs=[
                pl.BlockSpec((tm, tk), lambda i, j, k: (i, k)),  # activations
                pl.BlockSpec((tk, tn), lambda i, j, k: (k, j)),  # folded weight
                pl.BlockSpec((1, tn), lambda i, j, k: (0, j)),   # bias
            ],
            out_specs=pl.BlockSpec((tm, tn), lambda i, j, k: (i, j)),
            scratch_shapes=scratch_shapes,
        ),
        compiler_params=pltpu.CompilerParams(
            dimension_semantics=("parallel", "parallel", "arbitrary"),
            vmem_limit_bytes=vmem_limit,
        ),
        cost_estimate=pl.CostEstimate(
            flops=2 * Mp * Np * Kp,
            transcendentals=0,
            bytes_accessed=bytes_accessed,
        ),
    )(x2d, params.w_kn, params.bias)

    out2d = out2d[:M, :N]
    return out2d.reshape(*lead, N)


# ----------------------------------------------------------------------------
# qparam bookkeeping (module init glue; mirrors _calculate_qparams for quint8).
# ----------------------------------------------------------------------------
def calculate_qparams(input_scale, input_min, input_max):
    quant_min, quant_max = 0, 255
    min_val = jnp.min(input_min * input_scale)
    max_val = jnp.max(input_max * input_scale)
    min_val_neg = jnp.minimum(min_val, 0.0)
    max_val_pos = jnp.maximum(max_val, 0.0)
    scale = (max_val_pos - min_val_neg) / float(quant_max - quant_min)
    scale = jnp.maximum(scale, jnp.float32(jnp.finfo(jnp.float32).eps))
    zero_point = quant_min - jnp.round(min_val_neg / scale).astype(jnp.int32)
    zero_point = jnp.clip(zero_point, quant_min, quant_max)
    return scale, zero_point


if __name__ == "__main__":
    key = jax.random.PRNGKey(0)
    keys = jax.random.split(key, 10)
    (k_x, k_w, k_b, k_s, k_mn, k_mx, k_x2, k_w2, k_b2, k_s2) = keys

    # --- small shape matching the module's typical use -----------------------
    batch, seq, in_features, out_features = 2, 8, 32, 64

    x = jax.random.normal(k_x, (batch, seq, in_features), dtype=jnp.float32)
    weight = jax.random.normal(k_w, (out_features, in_features), dtype=jnp.float32) * 0.1
    bias = jax.random.normal(k_b, (out_features,), dtype=jnp.float32) * 0.1
    input_scale = jax.random.uniform(
        k_s, (in_features,), dtype=jnp.float32, minval=0.5, maxval=2.0
    )
    input_min = -jnp.abs(jax.random.normal(k_mn, (in_features,), dtype=jnp.float32))
    input_max = jnp.abs(jax.random.normal(k_mx, (in_features,), dtype=jnp.float32))

    # module-init bookkeeping (qparams unused in the fp forward path)
    q_scale, q_zero_point = calculate_qparams(input_scale, input_min, input_max)

    # Reference in plain JAX (original, unfused formulation).
    ref = (x * input_scale) @ weight.T + bias

    # (a) f32-weight path: exercises the no-scratch f32-output kernel, strict check.
    params_f32 = prepare_sq_linear_params(
        weight, input_scale, bias, compute_dtype=jnp.float32
    )
    out_f32 = jax.block_until_ready(sq_linear_forward(x, params_f32))
    assert out_f32.shape == (batch, seq, out_features)
    assert jnp.allclose(out_f32, ref, atol=1e-3, rtol=1e-3)

    # (b) default bf16 compute path (f32 in / f32 out, bf16 MXU, f32 accumulate).
    params_bf16 = prepare_sq_linear_params(weight, input_scale, bias)  # bf16 default
    out_bf = jax.block_until_ready(sq_linear_forward(x, params_bf16))
    assert out_bf.shape == (batch, seq, out_features)
    assert jnp.allclose(out_bf, ref, atol=5e-2, rtol=5e-2)

    # (c) bf16 in / bf16 out: exercises the f32-VMEM-accumulator kernel.
    out_bf_io = jax.block_until_ready(
        sq_linear_forward(x.astype(jnp.bfloat16), params_bf16)
    )
    assert out_bf_io.dtype == jnp.bfloat16
    assert jnp.allclose(out_bf_io.astype(jnp.float32), ref, atol=5e-2, rtol=5e-2)

    # (d) non-128-aligned dims: exercises init-time K/N padding + adaptive tm.
    b2, s2, K2, N2 = 2, 24, 80, 200
    x2 = jax.random.normal(k_x2, (b2, s2, K2), dtype=jnp.float32)
    weight2 = jax.random.normal(k_w2, (N2, K2), dtype=jnp.float32) * 0.1
    bias2 = jax.random.normal(k_b2, (N2,), dtype=jnp.float32) * 0.1
    scale2 = jax.random.uniform(k_s2, (K2,), dtype=jnp.float32, minval=0.5, maxval=2.0)
    params2 = prepare_sq_linear_params(weight2, scale2, bias2)  # bf16 default
    ref2 = (x2 * scale2) @ weight2.T + bias2
    out2 = jax.block_until_ready(sq_linear_forward(x2, params2))
    assert out2.shape == (b2, s2, N2)
    assert jnp.allclose(out2, ref2, atol=5e-2, rtol=5e-2)

    print("KERNEL_OK")
</pallas_src>

<mosaic_0001>
module attributes {stable_mosaic.version = 11 : i64} {
  func.func @_sq_linear_kernel_f32out(%arg0: i32, %arg1: i32, %arg2: i32, %arg3: memref<16x128xf32, #tpu.memory_space<vmem>>, %arg4: memref<128x128xf32, #tpu.memory_space<vmem>>, %arg5: memref<1x128xf32, #tpu.memory_space<vmem>>, %arg6: memref<16x128xf32, #tpu.memory_space<vmem>>) attributes {dimension_semantics = [#tpu.dimension_semantics<parallel>, #tpu.dimension_semantics<parallel>, #tpu.dimension_semantics<arbitrary>], iteration_bounds = array<i64: 1, 1, 1>, scalar_prefetch = 0 : i64, scratch_operands = 0 : i64, tpu.core_type = #tpu.core_type<tc>, window_params = [{transform_indices = @transform_0, window_bounds = array<i64: 16, 128>}, {transform_indices = @transform_1, window_bounds = array<i64: 128, 128>}, {transform_indices = @transform_2, window_bounds = array<i64: 1, 128>}, {transform_indices = @transform_3, window_bounds = array<i64: 16, 128>}]} {
    %c0_i32 = arith.constant 0 : i32
    %0 = arith.cmpi eq, %arg2, %c0_i32 : i32
    %1 = arith.extui %0 : i1 to i32
    %c0_i32_0 = arith.constant 0 : i32
    %2 = arith.cmpi ne, %1, %c0_i32_0 : i32
    scf.if %2 {
      %cst_8 = arith.constant 0.000000e+00 : f32
      %9 = vector.broadcast %cst_8 : f32 to vector<16x128xf32>
      %c0_9 = arith.constant 0 : index
      %c0_10 = arith.constant 0 : index
      %10 = vector.load %arg5[%c0_9, %c0_10] : memref<1x128xf32, #tpu.memory_space<vmem>>, vector<1x128xf32>
      %11 = vector.broadcast %10 : vector<1x128xf32> to vector<16x128xf32>
      %12 = arith.addf %9, %11 : vector<16x128xf32>
      %c0_11 = arith.constant 0 : index
      %c0_12 = arith.constant 0 : index
      %13 = vector.load %arg6[%c0_11, %c0_12] : memref<16x128xf32, #tpu.memory_space<vmem>>, vector<16x128xf32>
      tpu.vector_store %arg6[%c0_11, %c0_12], %12 {strides = array<i32>} : memref<16x128xf32, #tpu.memory_space<vmem>>, vector<16x128xf32>,
    } else {
    }
    %c0 = arith.constant 0 : index
    %c0_1 = arith.constant 0 : index
    %3 = vector.load %arg6[%c0, %c0_1] : memref<16x128xf32, #tpu.memory_space<vmem>>, vector<16x128xf32>
    %c0_2 = arith.constant 0 : index
    %c0_3 = arith.constant 0 : index
    %4 = vector.load %arg3[%c0_2, %c0_3] : memref<16x128xf32, #tpu.memory_space<vmem>>, vector<16x128xf32>
    %c0_4 = arith.constant 0 : index
    %c0_5 = arith.constant 0 : index
    %5 = vector.load %arg4[%c0_4, %c0_5] : memref<128x128xf32, #tpu.memory_space<vmem>>, vector<128x128xf32>
    %cst = arith.constant dense<0.000000e+00> : vector<16x128xf32>
    %6 = tpu.matmul %4, %5, %cst {dimension_numbers = #tpu.dot_dimension_numbers<[1], [0], [0], [1], [0, 0, 1, 1], [], []>} : vector<16x128xf32>, vector<128x128xf32>, vector<16x128xf32> -> vector<16x128xf32>
    %7 = arith.addf %3, %6 : vector<16x128xf32>
    %c0_6 = arith.constant 0 : index
    %c0_7 = arith.constant 0 : index
    %8 = vector.load %arg6[%c0_6, %c0_7] : memref<16x128xf32, #tpu.memory_space<vmem>>, vector<16x128xf32>
    tpu.vector_store %arg6[%c0_6, %c0_7], %7 {strides = array<i32>} : memref<16x128xf32, #tpu.memory_space<vmem>>, vector<16x128xf32>,
    return
  }
  func.func @transform_0(%arg0: i32, %arg1: i32, %arg2: i32) -> (i32, i32) {
    %c0_i32 = arith.constant 0 : i32
    return %arg0, %arg2 : i32, i32
  }
  func.func @transform_1(%arg0: i32, %arg1: i32, %arg2: i32) -> (i32, i32) {
    %c0_i32 = arith.constant 0 : i32
    return %arg2, %arg1 : i32, i32
  }
  func.func @transform_2(%arg0: i32, %arg1: i32, %arg2: i32) -> (i32, i32) {
    %c0_i32 = arith.constant 0 : i32
    %c0_i32_0 = arith.constant 0 : i32
    return %c0_i32, %arg1 : i32, i32
  }
  func.func @transform_3(%arg0: i32, %arg1: i32, %arg2: i32) -> (i32, i32) {
    %c0_i32 = arith.constant 0 : i32
    return %arg0, %arg1 : i32, i32
  }
}

</mosaic_0001>

<bundles_post_ra>
// kernel: tpu_custom_call.1
= control target key start
LH: loop header
LB: loop body
LE: loop exit
PB: predicated region body
PF: predicated region fallthrough
CT: control target
= control target key end

     0   :  { %8 = vsyncpa [#allocation3], 0  ;;  %s345_s0 = inlined_call_operand.hbm [shape: f32[16,128], index: 0, kind: input, shape index: {}]   ;;  %s346_s1 = inlined_call_operand.hbm [shape: f32[128,128], index: 1, kind: input, shape index: {}]   ;;  %s347_s2 = inlined_call_operand.vmem [shape: f32[1,128], index: 2, kind: input, shape index: {}]   ;;  %s348_s3 = inlined_call_operand.hbm [shape: f32[16,128], index: 3, kind: output, shape index: {}]  }
   0x1   :  { %9 = vsyncpa [#allocation6], 0 }
   0x2   :  { %10 = vsyncpa [#allocation4], 0  ;;  %s299_s12 = smov [#allocation2]  }
   0x3   :  { %s16_s13 = sshll.u32 %s299_s12, 4  ;;  %s17_s13 = int_to_ptr.vmem [resolvable:$true] %s16_s13 }
   0x4   :  { %s241_s14 = scalar_lea.vmem %s17_s13, 256  ;;  %p246_p1 = scmp.lt.s32.totalorder %s17_s13, %s17_s13 }
   0x5   :  { %p242_p0 = scmp.ne.s32.totalorder %s17_s13, %s241_s14  ;;  %p247_p2 = scmp.lt.s32.totalorder %s241_s14, %s241_s14 }
   0x7   :  { %p248_p3 = por %p247_p2, %p246_p1 }
   0x9   :  { %p249_p4 = pnand %p248_p3, %p242_p0 }
   0xb   :  { %252 = shalt.err (!%p249_p4)
}
   0xc   :  { %s300_s15 = smov 128   ;;  %s301_s16 = smov 8  }
   0xd   :  { %22 = dma.hbm_to_vmem [thread:$0]  %s345_s0, 256, %s17_s13, [#allocation3], %s300_s15, %s300_s15, %s301_s16  }
   0xe   :  { %s302_s19 = smov [#allocation5]  }
   0xf   :  { %s28_s20 = sshll.u32 %s302_s19, 4  ;;  %s29_s20 = int_to_ptr.vmem [resolvable:$true] %s28_s20 }
  0x10   :  { %s261_s21 = scalar_lea.vmem %s29_s20, 2048  ;;  %p266_p6 = scmp.lt.s32.totalorder %s29_s20, %s29_s20 }
  0x11   :  { %p262_p5 = scmp.ne.s32.totalorder %s29_s20, %s261_s21  ;;  %p267_p7 = scmp.lt.s32.totalorder %s261_s21, %s261_s21 }
  0x13   :  { %p268_p8 = por %p267_p7, %p266_p6 }
  0x15   :  { %p269_p9 = pnand %p268_p8, %p262_p5 }
  0x17   :  { %272 = shalt.err (!%p269_p9)
}
  0x18   :  { %34 = dma.hbm_to_vmem [thread:$0]  %s346_s1, 2048, %s29_s20, [#allocation6], %s300_s15, %s300_s15, %s301_s16  }
  0x19   :  { %293 = dma.done.wait [#allocation3], 256  }
  0x1a   :  { %294 = vsyncadd [#allocation3], 4294967040 }
  0x1b   :  { %295 = dma.done.wait [#allocation6], 2048  }
  0x1c   :  { %296 = vsyncadd [#allocation6], 4294965248  ;;  %v76_v0 = vld [vmem:[#allocation5 + $0x78] sm:$0xff]  ;;  %v75_v1 = vld [vmem:[#allocation5 + $0x70] sm:$0xff]  ;;  %s303_s24 = smov [#allocation7]  }
  0x1d   :  { %193 = vmatprep.subr.mxu0 %v76_v0  ;;  %v74_v2 = vld [vmem:[#allocation5 + $0x68] sm:$0xff]  ;;  %v73_v3 = vld [vmem:[#allocation5 + $0x60] sm:$0xff]  ;;  %v59_v4 = vld [vmem:[#allocation2] sm:$0xff]  ;;  %s161_s25 = sshll.u32 %s303_s24, 4  ;;  %s162_s25 = int_to_ptr.vmem [resolvable:$true] %s161_s25 }
  0x1e   :  { %194 = vmatpush3.msra.mxu0 %v76_v0  ;;  %v72_v5 = vld [vmem:[#allocation5 + $0x58] sm:$0xff]  ;;  %225 = vmatprep.mubr.f32.mxu0 %v59_v4  ;;  %v71_v6 = vld [vmem:[#allocation5 + $0x50] sm:$0xff]  ;;  %v70_v7 = vld [vmem:[#allocation5 + $0x48] sm:$0xff]  ;;  %s273_s26 = scalar_lea.vmem %s162_s25, 256  ;;  %p278_p11 = scmp.lt.s32.totalorder %s162_s25, %s162_s25 }
  0x1f   :  { %195 = vmatprep.subr.mxu0 %v75_v1  ;;  %v69_v8 = vld [vmem:[#allocation5 + $0x40] sm:$0xff]  ;;  %v68_v9 = vld [vmem:[#allocation5 + $0x38] sm:$0xff]  ;;  %v67_v10 = vld [vmem:[#allocation5 + $0x30] sm:$0xff]  ;;  %p274_p10 = scmp.ne.s32.totalorder %s162_s25, %s273_s26  ;;  %p279_p12 = scmp.lt.s32.totalorder %s273_s26, %s273_s26 }
  0x20   :  { %196 = vmatpush3.msra.mxu0 %v75_v1  ;;  %v66_v11 = vld [vmem:[#allocation5 + $0x28] sm:$0xff]  ;;  %v65_v12 = vld [vmem:[#allocation5 + $0x20] sm:$0xff]  ;;  %v64_v13 = vld [vmem:[#allocation5 + $0x18] sm:$0xff] }
  0x21   :  { %197 = vmatprep.subr.mxu0 %v74_v2  ;;  %v63_v14 = vld [vmem:[#allocation5 + $0x10] sm:$0xff]  ;;  %v62_v15 = vld [vmem:[#allocation5 + $0x8] sm:$0xff]  ;;  %v61_v16 = vld [vmem:[#allocation5] sm:$0xff]  ;;  %p280_p13 = por %p279_p12, %p278_p11 }
  0x22   :  { %198 = vmatpush3.msra.mxu0 %v74_v2  ;;  %v60_v17 = vld [vmem:[#allocation2 + $0x8] sm:$0xff]  ;;  %v174_v18 = vld [vmem:[%s347_s2] ss:$0 sm:$0xff] }
  0x23   :  { %199 = vmatprep.subr.mxu0 %v73_v3  ;;  %p281_p0 = pnand %p280_p13, %p274_p10 }
  0x24   :  { %200 = vmatpush3.msra.mxu0 %v73_v3 }
  0x25   :  { %201 = vmatprep.subr.mxu0 %v72_v5 }
  0x26   :  { %202 = vmatpush3.msra.mxu0 %v72_v5 }
  0x27   :  { %203 = vmatprep.subr.mxu0 %v71_v6 }
  0x28   :  { %204 = vmatpush3.msra.mxu0 %v71_v6 }
  0x29   :  { %205 = vmatprep.subr.mxu0 %v70_v7 }
  0x2a   :  { %206 = vmatpush3.msra.mxu0 %v70_v7 }
  0x2b   :  { %207 = vmatprep.subr.mxu0 %v69_v8 }
  0x2c   :  { %208 = vmatpush3.msra.mxu0 %v69_v8 }
  0x2d   :  { %209 = vmatprep.subr.mxu0 %v68_v9 }
  0x2e   :  { %210 = vmatpush3.msra.mxu0 %v68_v9 }
  0x2f   :  { %211 = vmatprep.subr.mxu0 %v67_v10 }
  0x30   :  { %212 = vmatpush3.msra.mxu0 %v67_v10 }
  0x31   :  { %213 = vmatprep.subr.mxu0 %v66_v11 }
  0x32   :  { %214 = vmatpush3.msra.mxu0 %v66_v11 }
  0x33   :  { %215 = vmatprep.subr.mxu0 %v65_v12 }
  0x34   :  { %216 = vmatpush3.msra.mxu0 %v65_v12 }
  0x35   :  { %217 = vmatprep.subr.mxu0 %v64_v13 }
  0x36   :  { %218 = vmatpush3.msra.mxu0 %v64_v13 }
  0x37   :  { %219 = vmatprep.subr.mxu0 %v63_v14 }
  0x38   :  { %220 = vmatpush3.msra.mxu0 %v63_v14 }
  0x39   :  { %221 = vmatprep.subr.mxu0 %v62_v15 }
  0x3a   :  { %222 = vmatpush3.msra.mxu0 %v62_v15 }
  0x3b   :  { %223 = vmatprep.subr.mxu0 %v61_v16 }
  0x3c   :  { %224 = vmatpush3.msra.mxu0 %v61_v16 }
  0x3d   :  { %226 = vmatmul.mubr.f32.vlgmr.msra.gmra.mxu0 %v60_v17 }
  0xfd   :  { %v227_v19 = vpop.f32.mrf.mxu0 }
  0xfe   :  { %v153_v20 = vadd.f32 %v227_v19, %v174_v18 }
  0xff   :  { %v143_v21 = vpop.f32.mrf.mxu0 }
 0x100   :  { %155 = vst [vmem:[#allocation7 + $0x8] sm:$0xff] %v153_v20  ;;  %v152_v22 = vadd.f32 %v174_v18, %v143_v21 }
 0x102   :  { %154 = vst [vmem:[#allocation7] sm:$0xff] %v152_v22 }
 0x103   :  { %284 = shalt.err (!%p281_p0)
}
 0x104   :  { %167 = dma.vmem_to_hbm [thread:$0]  %s162_s25, 256, %s348_s3, [#allocation4], %s300_s15, %s300_s15, %s301_s16  }
 0x105   :  { %297 = dma.done.wait [#allocation4], 256  }
 0x106   :  { %298 = vsyncadd [#allocation4], 4294967040 }
 0x107   :  { %171 = vsyncpa [#allocation3], 1 }
 0x108   :  { %172 = vsyncpa [#allocation6], 1 }
 0x109   :  { %173 = vsyncpa [#allocation4], 1 }

</bundles_post_ra>
